<compile_context>
chip_gen: v7x
topology: tpu7x:2x2x1
jax: 0.10.0
libtpu: 0.0.40
codegen_flags: <defaults>
</compile_context>

<pallas_src>
import jax
import jax.numpy as jnp
from jax.experimental import pallas as pl
from jax.experimental.pallas import tpu as pltpu


def _make_kernel(B, H, Kh, row_n):
    """Conv-as-row-matmuls kernel: Kh shifted matmuls per batch element."""

    def kernel(x_ref, m_ref, b_ref, o_ref):
        # x_ref: (B, Hp, Wp*Cin)       f32 zero-padded, lane-densified image rows
        # m_ref: (Kh, Wp*Cin, row_n)   f32 banded row->row conv weight slabs
        # b_ref: (1, row_n)            f32 bias pre-tiled to the output lane order
        # o_ref: (B, H, row_n)         f32 conv output, row_n = W*Cout*s^2 (lane-dense)
        bias = b_ref[...]                      # hoisted once, broadcast over sublanes
        for b in range(B):                     # unrolled; B is tiny here
            acc = jnp.zeros((H, row_n), jnp.float32)
            for di in range(Kh):               # unrolled over kernel rows
                rows = x_ref[b, di:di + H, :]  # (H, Wp*Cin) sublane-offset row slice
                acc = acc + jnp.dot(rows, m_ref[di],
                                    preferred_element_type=jnp.float32)
            o_ref[b] = acc + bias              # (H, 256) unmasked lane-dense store

    return kernel


def pixel_shuffle_pack(x_nchw, weight, bias, scale_factor):
    """Forward of PixelShufflePack: Conv2d(padding=(k-1)//2) -> F.pixel_shuffle.

    x_nchw: (B, Cin, H, W)
    weight: (Cout*scale^2, Cin, Kh, Kw)   (PyTorch OIHW conv weight)
    bias:   (Cout*scale^2,)
    returns (B, Cout, H*scale, W*scale)   float32
    """
    B, Cin, H, W = x_nchw.shape
    Cout_total, Cin_w, Kh, Kw = weight.shape
    assert Cin_w == Cin
    # PyTorch padding=(k-1)//2 reproduces "same" output size only for odd square kernels.
    assert Kh == Kw and Kh % 2 == 1, "only odd square upsample kernels are supported"
    s = scale_factor
    assert Cout_total % (s * s) == 0
    Cout = Cout_total // (s * s)
    pad = (Kh - 1) // 2
    Hp, Wp = H + 2 * pad, W + 2 * pad
    row_k = Wp * Cin            # contraction dim of each row matmul
    row_n = W * Cout_total      # output lane dim (256 here -> unmasked stores)

    # ---- cheap XLA-side prep (single pass over the small input / weights) ----
    # NCHW -> NHWC f32, zero-pad spatially, densify the lane axis to Wp*Cin.
    x = jnp.transpose(x_nchw, (0, 2, 3, 1)).astype(jnp.float32)
    xp = jnp.pad(x, ((0, 0), (pad, pad), (pad, pad), (0, 0))).reshape(B, Hp, row_k)

    # Banded ("row-Toeplitz") weight slabs: for every kernel row di,
    #   M[di][(w+dj)*Cin + c, w*Cout_total + o] = weight[o, c, di, dj]
    # so that conv2d[b, o, h, w] = bias[o] + sum_di (xp[b, h+di, :] @ M[di])[w*Cout_total + o].
    w_t = jnp.transpose(weight, (2, 3, 1, 0)).astype(jnp.float32)   # (Kh, Kw, Cin, Cout_total)
    eye_w = jnp.eye(W, dtype=jnp.float32)
    m_rows = []
    for di in range(Kh):
        m_di = jnp.zeros((row_k, row_n), jnp.float32)
        for dj in range(Kw):
            blk = jnp.kron(eye_w, w_t[di, dj])            # (W*Cin, W*Cout_total) block-diagonal
            m_di = m_di.at[dj * Cin:dj * Cin + W * Cin, :].add(blk)
        m_rows.append(m_di)
    m = jnp.stack(m_rows, axis=0)                         # (Kh, row_k, row_n)

    b_row = jnp.tile(bias.astype(jnp.float32), W).reshape(1, row_n)

    kernel = _make_kernel(B, H, Kh, row_n)

    # Single grid step: the whole problem fits comfortably in VMEM on every
    # generation (input+weights+output << 1 MiB at these shapes).  For unmasked
    # lane-dense stores W*Cout*s^2 should be a multiple of 128 and H a multiple
    # of 8 (perf, not correctness).
    conv = pl.pallas_call(
        kernel,
        out_shape=jax.ShapeDtypeStruct((B, H, row_n), jnp.float32),
        grid=(1,),
        in_specs=[
            pl.BlockSpec((B, Hp, row_k), lambda i: (0, 0, 0)),
            pl.BlockSpec((Kh, row_k, row_n), lambda i: (0, 0, 0)),
            pl.BlockSpec((1, row_n), lambda i: (0, 0)),
        ],
        out_specs=pl.BlockSpec((B, H, row_n), lambda i: (0, 0, 0)),
        compiler_params=pltpu.CompilerParams(
            dimension_semantics=("arbitrary",)),
    )(xp, m, b_row)

    # ---- pixel_shuffle (exact PyTorch NCHW semantics), one permutation pass ----
    # conv[b, h, w*Cout_total + o] == conv2d[b, o, h, w];  o = c*s*s + i*s + j
    # out[b, c, h*s+i, w*s+j] = conv2d[b, c*s*s + i*s + j, h, w]
    y = conv.reshape(B, H, W, Cout, s, s)
    y = jnp.transpose(y, (0, 3, 1, 4, 2, 5)).reshape(B, Cout, H * s, W * s)
    return y


def _reference(x, weight, bias, s):
    """Pure-JAX f32 reference: lax conv (SAME) + pixel_shuffle."""
    y = jax.lax.conv_general_dilated(
        x, weight, window_strides=(1, 1), padding='SAME',
        dimension_numbers=('NCHW', 'OIHW', 'NCHW'))
    y = y + bias[None, :, None, None]
    B, C, H, W = y.shape
    Cout = C // (s * s)
    y = y.reshape(B, Cout, s, s, H, W)
    y = jnp.transpose(y, (0, 1, 4, 2, 5, 3)).reshape(B, Cout, H * s, W * s)
    return y


if __name__ == "__main__":
    # Module config: in_channels=4, out_channels=4, scale_factor=2, upsample_kernel=3
    in_channels, out_channels, scale_factor, upsample_kernel = 4, 4, 2, 3
    conv_out = out_channels * scale_factor * scale_factor      # 16

    key = jax.random.PRNGKey(0)
    kx, kw, kb = jax.random.split(key, 3)

    x = jax.random.normal(kx, (2, in_channels, 16, 16), dtype=jnp.float32)
    # deterministic synthetic init (stands in for PixelShufflePack.init_weights)
    weight = 0.1 * jax.random.normal(
        kw, (conv_out, in_channels, upsample_kernel, upsample_kernel), dtype=jnp.float32)
    bias = 0.1 * jax.random.normal(kb, (conv_out,), dtype=jnp.float32)

    out = pixel_shuffle_pack(x, weight, bias, scale_factor)
    out = jax.block_until_ready(out)

    ref = _reference(x, weight, bias, scale_factor)
    assert out.shape == (2, out_channels, 32, 32), out.shape
    # f32 end-to-end: only summation-order differences vs the XLA conv reference
    assert jnp.allclose(out, ref, atol=1e-3, rtol=1e-3), "mismatch vs reference"

    print("KERNEL_OK")
</pallas_src>

<mosaic_0001>
module attributes {stable_mosaic.version = 11 : i64} {
  func.func @kernel(%arg0: i32, %arg1: memref<2x18x72xf32, #tpu.memory_space<vmem>>, %arg2: memref<3x72x256xf32, #tpu.memory_space<vmem>>, %arg3: memref<1x256xf32, #tpu.memory_space<vmem>>, %arg4: memref<2x16x256xf32, #tpu.memory_space<vmem>>) attributes {dimension_semantics = [#tpu.dimension_semantics<arbitrary>], iteration_bounds = array<i64: 1>, scalar_prefetch = 0 : i64, scratch_operands = 0 : i64, tpu.core_type = #tpu.core_type<tc>, window_params = [{pipeline_mode = #tpu.pipeline_mode<synchronous>, transform_indices = @transform_0, window_bounds = array<i64: 2, 18, 72>}, {pipeline_mode = #tpu.pipeline_mode<synchronous>, transform_indices = @transform_1, window_bounds = array<i64: 3, 72, 256>}, {pipeline_mode = #tpu.pipeline_mode<synchronous>, transform_indices = @transform_2, window_bounds = array<i64: 1, 256>}, {pipeline_mode = #tpu.pipeline_mode<synchronous>, transform_indices = @transform_3, window_bounds = array<i64: 2, 16, 256>}]} {
    %c0 = arith.constant 0 : index
    %c0_0 = arith.constant 0 : index
    %0 = vector.load %arg3[%c0, %c0_0] : memref<1x256xf32, #tpu.memory_space<vmem>>, vector<1x256xf32>
    %cst = arith.constant 0.000000e+00 : f32
    %1 = vector.broadcast %cst : f32 to vector<16x256xf32>
    %c0_1 = arith.constant 0 : index
    %c0_2 = arith.constant 0 : index
    %c0_3 = arith.constant 0 : index
    %2 = vector.load %arg1[%c0_1, %c0_2, %c0_3] : memref<2x18x72xf32, #tpu.memory_space<vmem>>, vector<1x16x72xf32>
    %3 = vector.shape_cast %2 : vector<1x16x72xf32> to vector<16x72xf32>
    %c0_4 = arith.constant 0 : index
    %c0_5 = arith.constant 0 : index
    %c0_6 = arith.constant 0 : index
    %4 = vector.load %arg2[%c0_4, %c0_5, %c0_6] : memref<3x72x256xf32, #tpu.memory_space<vmem>>, vector<1x72x256xf32>
    %5 = vector.shape_cast %4 : vector<1x72x256xf32> to vector<72x256xf32>
    %cst_7 = arith.constant dense<0.000000e+00> : vector<16x256xf32>
    %6 = tpu.matmul %3, %5, %cst_7 {dimension_numbers = #tpu.dot_dimension_numbers<[1], [0], [0], [1], [0, 0, 1, 1], [], []>} : vector<16x72xf32>, vector<72x256xf32>, vector<16x256xf32> -> vector<16x256xf32>
    %7 = arith.addf %1, %6 : vector<16x256xf32>
    %c0_8 = arith.constant 0 : index
    %c1 = arith.constant 1 : index
    %c0_9 = arith.constant 0 : index
    %8 = vector.load %arg1[%c0_8, %c1, %c0_9] : memref<2x18x72xf32, #tpu.memory_space<vmem>>, vector<1x16x72xf32>
    %9 = vector.shape_cast %8 : vector<1x16x72xf32> to vector<16x72xf32>
    %c1_10 = arith.constant 1 : index
    %c0_11 = arith.constant 0 : index
    %c0_12 = arith.constant 0 : index
    %10 = vector.load %arg2[%c1_10, %c0_11, %c0_12] : memref<3x72x256xf32, #tpu.memory_space<vmem>>, vector<1x72x256xf32>
    %11 = vector.shape_cast %10 : vector<1x72x256xf32> to vector<72x256xf32>
    %cst_13 = arith.constant dense<0.000000e+00> : vector<16x256xf32>
    %12 = tpu.matmul %9, %11, %cst_13 {dimension_numbers = #tpu.dot_dimension_numbers<[1], [0], [0], [1], [0, 0, 1, 1], [], []>} : vector<16x72xf32>, vector<72x256xf32>, vector<16x256xf32> -> vector<16x256xf32>
    %13 = arith.addf %7, %12 : vector<16x256xf32>
    %c0_14 = arith.constant 0 : index
    %c2 = arith.constant 2 : index
    %c0_15 = arith.constant 0 : index
    %14 = vector.load %arg1[%c0_14, %c2, %c0_15] : memref<2x18x72xf32, #tpu.memory_space<vmem>>, vector<1x16x72xf32>
    %15 = vector.shape_cast %14 : vector<1x16x72xf32> to vector<16x72xf32>
    %c2_16 = arith.constant 2 : index
    %c0_17 = arith.constant 0 : index
    %c0_18 = arith.constant 0 : index
    %16 = vector.load %arg2[%c2_16, %c0_17, %c0_18] : memref<3x72x256xf32, #tpu.memory_space<vmem>>, vector<1x72x256xf32>
    %17 = vector.shape_cast %16 : vector<1x72x256xf32> to vector<72x256xf32>
    %cst_19 = arith.constant dense<0.000000e+00> : vector<16x256xf32>
    %18 = tpu.matmul %15, %17, %cst_19 {dimension_numbers = #tpu.dot_dimension_numbers<[1], [0], [0], [1], [0, 0, 1, 1], [], []>} : vector<16x72xf32>, vector<72x256xf32>, vector<16x256xf32> -> vector<16x256xf32>
    %19 = arith.addf %13, %18 : vector<16x256xf32>
    %20 = vector.broadcast %0 : vector<1x256xf32> to vector<16x256xf32>
    %21 = arith.addf %19, %20 : vector<16x256xf32>
    %c0_20 = arith.constant 0 : index
    %c0_21 = arith.constant 0 : index
    %c0_22 = arith.constant 0 : index
    %22 = vector.load %arg4[%c0_20, %c0_21, %c0_22] : memref<2x16x256xf32, #tpu.memory_space<vmem>>, vector<1x16x256xf32>
    %23 = vector.shape_cast %22 : vector<1x16x256xf32> to vector<16x256xf32>
    %24 = vector.shape_cast %21 : vector<16x256xf32> to vector<1x16x256xf32>
    tpu.vector_store %arg4[%c0_20, %c0_21, %c0_22], %24 {strides = array<i32>} : memref<2x16x256xf32, #tpu.memory_space<vmem>>, vector<1x16x256xf32>,
    %cst_23 = arith.constant 0.000000e+00 : f32
    %25 = vector.broadcast %cst_23 : f32 to vector<16x256xf32>
    %c1_24 = arith.constant 1 : index
    %c0_25 = arith.constant 0 : index
    %c0_26 = arith.constant 0 : index
    %26 = vector.load %arg1[%c1_24, %c0_25, %c0_26] : memref<2x18x72xf32, #tpu.memory_space<vmem>>, vector<1x16x72xf32>
    %27 = vector.shape_cast %26 : vector<1x16x72xf32> to vector<16x72xf32>
    %c0_27 = arith.constant 0 : index
    %c0_28 = arith.constant 0 : index
    %c0_29 = arith.constant 0 : index
    %28 = vector.load %arg2[%c0_27, %c0_28, %c0_29] : memref<3x72x256xf32, #tpu.memory_space<vmem>>, vector<1x72x256xf32>
    %29 = vector.shape_cast %28 : vector<1x72x256xf32> to vector<72x256xf32>
    %cst_30 = arith.constant dense<0.000000e+00> : vector<16x256xf32>
    %30 = tpu.matmul %27, %29, %cst_30 {dimension_numbers = #tpu.dot_dimension_numbers<[1], [0], [0], [1], [0, 0, 1, 1], [], []>} : vector<16x72xf32>, vector<72x256xf32>, vector<16x256xf32> -> vector<16x256xf32>
    %31 = arith.addf %25, %30 : vector<16x256xf32>
    %c1_31 = arith.constant 1 : index
    %c1_32 = arith.constant 1 : index
    %c0_33 = arith.constant 0 : index
    %32 = vector.load %arg1[%c1_31, %c1_32, %c0_33] : memref<2x18x72xf32, #tpu.memory_space<vmem>>, vector<1x16x72xf32>
    %33 = vector.shape_cast %32 : vector<1x16x72xf32> to vector<16x72xf32>
    %c1_34 = arith.constant 1 : index
    %c0_35 = arith.constant 0 : index
    %c0_36 = arith.constant 0 : index
    %34 = vector.load %arg2[%c1_34, %c0_35, %c0_36] : memref<3x72x256xf32, #tpu.memory_space<vmem>>, vector<1x72x256xf32>
    %35 = vector.shape_cast %34 : vector<1x72x256xf32> to vector<72x256xf32>
    %cst_37 = arith.constant dense<0.000000e+00> : vector<16x256xf32>
    %36 = tpu.matmul %33, %35, %cst_37 {dimension_numbers = #tpu.dot_dimension_numbers<[1], [0], [0], [1], [0, 0, 1, 1], [], []>} : vector<16x72xf32>, vector<72x256xf32>, vector<16x256xf32> -> vector<16x256xf32>
    %37 = arith.addf %31, %36 : vector<16x256xf32>
    %c1_38 = arith.constant 1 : index
    %c2_39 = arith.constant 2 : index
    %c0_40 = arith.constant 0 : index
    %38 = vector.load %arg1[%c1_38, %c2_39, %c0_40] : memref<2x18x72xf32, #tpu.memory_space<vmem>>, vector<1x16x72xf32>
    %39 = vector.shape_cast %38 : vector<1x16x72xf32> to vector<16x72xf32>
    %c2_41 = arith.constant 2 : index
    %c0_42 = arith.constant 0 : index
    %c0_43 = arith.constant 0 : index
    %40 = vector.load %arg2[%c2_41, %c0_42, %c0_43] : memref<3x72x256xf32, #tpu.memory_space<vmem>>, vector<1x72x256xf32>
    %41 = vector.shape_cast %40 : vector<1x72x256xf32> to vector<72x256xf32>
    %cst_44 = arith.constant dense<0.000000e+00> : vector<16x256xf32>
    %42 = tpu.matmul %39, %41, %cst_44 {dimension_numbers = #tpu.dot_dimension_numbers<[1], [0], [0], [1], [0, 0, 1, 1], [], []>} : vector<16x72xf32>, vector<72x256xf32>, vector<16x256xf32> -> vector<16x256xf32>
    %43 = arith.addf %37, %42 : vector<16x256xf32>
    %44 = vector.broadcast %0 : vector<1x256xf32> to vector<16x256xf32>
    %45 = arith.addf %43, %44 : vector<16x256xf32>
    %c1_45 = arith.constant 1 : index
    %c0_46 = arith.constant 0 : index
    %c0_47 = arith.constant 0 : index
    %46 = vector.load %arg4[%c1_45, %c0_46, %c0_47] : memref<2x16x256xf32, #tpu.memory_space<vmem>>, vector<1x16x256xf32>
    %47 = vector.shape_cast %46 : vector<1x16x256xf32> to vector<16x256xf32>
    %48 = vector.shape_cast %45 : vector<16x256xf32> to vector<1x16x256xf32>
    tpu.vector_store %arg4[%c1_45, %c0_46, %c0_47], %48 {strides = array<i32>} : memref<2x16x256xf32, #tpu.memory_space<vmem>>, vector<1x16x256xf32>,
    return
  }
  func.func @transform_0(%arg0: i32) -> (i32, i32, i32) {
    %c0_i32 = arith.constant 0 : i32
    %c0_i32_0 = arith.constant 0 : i32
    %c0_i32_1 = arith.constant 0 : i32
    %c0_i32_2 = arith.constant 0 : i32
    return %c0_i32, %c0_i32_0, %c0_i32_1 : i32, i32, i32
  }
  func.func @transform_1(%arg0: i32) -> (i32, i32, i32) {
    %c0_i32 = arith.constant 0 : i32
    %c0_i32_0 = arith.constant 0 : i32
    %c0_i32_1 = arith.constant 0 : i32
    %c0_i32_2 = arith.constant 0 : i32
    return %c0_i32, %c0_i32_0, %c0_i32_1 : i32, i32, i32
  }
  func.func @transform_2(%arg0: i32) -> (i32, i32) {
    %c0_i32 = arith.constant 0 : i32
    %c0_i32_0 = arith.constant 0 : i32
    %c0_i32_1 = arith.constant 0 : i32
    return %c0_i32, %c0_i32_0 : i32, i32
  }
  func.func @transform_3(%arg0: i32) -> (i32, i32, i32) {
    %c0_i32 = arith.constant 0 : i32
    %c0_i32_0 = arith.constant 0 : i32
    %c0_i32_1 = arith.constant 0 : i32
    %c0_i32_2 = arith.constant 0 : i32
    return %c0_i32, %c0_i32_0, %c0_i32_1 : i32, i32, i32
  }
}

</mosaic_0001>

<bundles_post_ra>
// kernel: tpu_custom_call.1
= control target key start
LH: loop header
LB: loop body
LE: loop exit
PB: predicated region body
PF: predicated region fallthrough
CT: control target
= control target key end

     0   :  { %8 = vsyncpa [#allocation3], 0  ;;  %s1006_s0 = inlined_call_operand.vmem [shape: f32[2,18,72], index: 0, kind: input, shape index: {}]   ;;  %s1007_s1 = inlined_call_operand.hbm [shape: f32[3,72,256], index: 1, kind: input, shape index: {}]   ;;  %s1008_s2 = inlined_call_operand.vmem [shape: f32[1,256], index: 2, kind: input, shape index: {}]   ;;  %s1009_s3 = inlined_call_operand.hbm [shape: f32[2,16,256], index: 3, kind: output, shape index: {}]  }
   0x1   :  { %9 = vsyncpa [#allocation4], 0  ;;  %s888_s12 = smov [#allocation2]   ;;  %s840_s16 = scalar_lea.hbm %s1007_s1, 6912 }
   0x2   :  { %s17_s13 = sshll.u32 %s888_s12, 4  ;;  %p841_p0 = scmp.ne.s32.totalorder %s1007_s1, %s840_s16  ;;  %s18_s13 = int_to_ptr.vmem [resolvable:$true] %s17_s13 }
   0x3   :  { %p844_p1 = scmp.lt.u32.totalorder %s840_s16, %s1007_s1 }
   0x5   :  { %p846_p2 = pnand %p844_p1, %p841_p0 }
   0x7   :  { %849 = shalt.err (!%p846_p2)
}
   0x8   :  { %s850_s21 = scalar_lea.vmem %s18_s13, 6912  ;;  %p855_p4 = scmp.lt.s32.totalorder %s18_s13, %s18_s13 }
   0x9   :  { %p851_p3 = scmp.ne.s32.totalorder %s18_s13, %s850_s21  ;;  %p856_p5 = scmp.lt.s32.totalorder %s850_s21, %s850_s21 }
   0xb   :  { %p857_p6 = por %p856_p5, %p855_p4 }
   0xd   :  { %p858_p7 = pnand %p857_p6, %p851_p3 }
   0xf   :  { %861 = shalt.err (!%p858_p7)
}
  0x10   :  { %s889_s22 = smov 256   ;;  %s890_s23 = smov 16  }
  0x11   :  { %23 = dma.hbm_to_vmem [thread:$0]  %s1007_s1, 6912, %s18_s13, [#allocation3], %s889_s22, %s889_s22, %s890_s23  }
  0x12   :  { %884 = dma.done.wait [#allocation3], 6912  }
  0x13   :  { %885 = vsyncadd [#allocation3], 4294960384  ;;  %v891_v0 = vmov 0.0   ;;  %v54_v1 = vld [vmem:[#allocation2 + $0x98] sm:$0xff]  ;;  %v56_v2 = vld [vmem:[#allocation2 + $0xa8] sm:$0xff]  ;;  %vm71_vm0 = vcmask 588800  }
  0x14   :  { %142 = vmatprep.mubr.f32.mxu0 %v891_v0  ;;  %476 = vmatprep.mubr.f32.mxu1 %v891_v0  ;;  %v53_v3 = vld [vmem:[#allocation2 + $0x90] sm:$0xff]  ;;  %v723_v4 = vpack.c.bf16 %v56_v2, %v54_v1  ;;  %v55_v5 = vld [vmem:[#allocation2 + $0xa0] sm:$0xff]  ;;  %v58_v6 = vld [vmem:[#allocation2 + $0xb8] sm:$0xff] }
  0x15   :  { %v60_v7 = vld [vmem:[#allocation2 + $0xc8] sm:$0xff]  ;;  %v725_v8 = vpack.c.bf16 %v55_v5, %v53_v3  ;;  %v57_v10 = vld [vmem:[#allocation2 + $0xb0] sm:$0xff]  ;;  %v59_v11 = vld [vmem:[#allocation2 + $0xc0] sm:$0xff] }
  0x16   :  { %v727_v9 = vpack.c.bf16 %v60_v7, %v58_v6  ;;  %v62_v12 = vld [vmem:[#allocation2 + $0xd8] sm:$0xff]  ;;  %724 = vmatprep.subr.bf16.mxu0 %v723_v4  ;;  %772 = vmatprep.subr.bf16.mxu1 %v723_v4  ;;  %v64_v13 = vld [vmem:[#allocation2 + $0xe8] sm:$0xff]  ;;  %v729_v14 = vpack.c.bf16 %v59_v11, %v57_v10  ;;  %v61_v16 = vld [vmem:[#allocation2 + $0xd0] sm:$0xff] }
  0x17   :  { %726 = vmatpush1.bf16.msra.mxu0 %v725_v8  ;;  %774 = vmatpush1.bf16.msra.mxu1 %v725_v8  ;;  %v731_v15 = vpack.c.bf16 %v64_v13, %v62_v12  ;;  %v63_v17 = vld [vmem:[#allocation2 + $0xe0] sm:$0xff]  ;;  %v66_v18 = vld [vmem:[#allocation2 + $0xf8] sm:$0xff]  ;;  %v68_v19 = vld [vmem:[#allocation2 + $0x108] sm:$0xff] }
  0x18   :  { %728 = vmatprep.subr.bf16.mxu0 %v727_v9  ;;  %776 = vmatprep.subr.bf16.mxu1 %v727_v9  ;;  %v733_v20 = vpack.c.bf16 %v63_v17, %v61_v16  ;;  %v735_v21 = vpack.c.bf16 %v68_v19, %v66_v18  ;;  %v65_v22 = vld [vmem:[#allocation2 + $0xf0] sm:$0xff]  ;;  %v67_v23 = vld [vmem:[#allocation2 + $0x100] sm:$0xff]  ;;  %v70_v25 = vld [vmem:[#allocation2 + $0x118] sm:$0xff] }
  0x19   :  { %v737_v24 = vpack.c.bf16 %v67_v23, %v65_v22  ;;  %v33_v26 = vld [vmem:[#allocation2 + $0x8] sm:$0xff]  ;;  %v35_v27 = vld [vmem:[#allocation2 + $0x18] sm:$0xff]  ;;  %v32_v28 = vld [vmem:[#allocation2] sm:$0xff] }
  0x1a   :  { %v34_v29 = vld [vmem:[#allocation2 + $0x10] sm:$0xff]  ;;  %v739_v31 = vpack.c.bf16 %v35_v27, %v33_v26  ;;  %v37_v32 = vld [vmem:[#allocation2 + $0x28] sm:$0xff]  ;;  %v39_v33 = vld [vmem:[#allocation2 + $0x38] sm:$0xff] }
  0x1b   :  { %730 = vmatpush1.bf16.msra.mxu0 %v729_v14  ;;  %778 = vmatpush1.bf16.msra.mxu1 %v729_v14  ;;  %v69_v30 = vld [vmem:[#allocation2 + $0x110] sm:$0xff]  ;;  %v741_v35 = vpack.c.bf16 %v34_v29, %v32_v28  ;;  %v743_v37 = vpack.c.bf16 %v39_v33, %v37_v32  ;;  %v36_v38 = vld [vmem:[#allocation2 + $0x20] sm:$0xff]  ;;  %v41_v40 = vld [vmem:[#allocation2 + $0x48] sm:$0xff]  ;;  %v347_v28 = vlaneseq }
  0x1c   :  { %732 = vmatprep.subr.bf16.mxu0 %v731_v15  ;;  %780 = vmatprep.subr.bf16.mxu1 %v731_v15  ;;  %v50_v34 = vld [vmem:[%s1006_s0 + $0x1] sm:$0xff]  ;;  %v713_v36 = vld [vmem:[%s1006_s0 + $0x19] sm:$0xff]  ;;  %v51_v43 = vld [vmem:[%s1006_s0 + $0x9] sm:$0xff] }
  0x1d   :  { %v38_v39 = vld [vmem:[#allocation2 + $0x30] sm:$0xff]  ;;  %v43_v41 = vld [vmem:[#allocation2 + $0x58] sm:$0xff]  ;;  %v40_v46 = vld [vmem:[#allocation2 + $0x40] sm:$0xff]  ;;  %v348_v29 = vshrl.u32 %v347_v28, 7 }
  0x1e   :  { %v745_v42 = vpack.c.bf16 %v38_v39, %v36_v38  ;;  %v714_v44 = vld [vmem:[%s1006_s0 + $0x21] sm:$0xff]  ;;  %v747_v45 = vpack.c.bf16 %v43_v41, %v41_v40  ;;  %v45_v48 = vld [vmem:[#allocation2 + $0x68] sm:$0xff]  ;;  %v44_v52 = vld [vmem:[#allocation2 + $0x60] sm:$0xff] }
  0x1f   :  { %734 = vmatpush1.bf16.msra.mxu0 %v733_v20  ;;  %782 = vmatpush1.bf16.msra.mxu1 %v733_v20  ;;  %v42_v47 = vld [vmem:[#allocation2 + $0x50] sm:$0xff]  ;;  %v47_v49 = vld [vmem:[#allocation2 + $0x78] sm:$0xff]  ;;  %v49_v55 = vld [vmem:[#allocation2 + $0x88] sm:$0xff] }
  0x20   :  { %736 = vmatprep.subr.bf16.mxu0 %v735_v21  ;;  %784 = vmatprep.subr.bf16.mxu1 %v735_v21  ;;  %v749_v50 = vpack.c.bf16 %v42_v47, %v40_v46  ;;  %v751_v51 = vpack.c.bf16 %v47_v49, %v45_v48  ;;  %v46_v53 = vld [vmem:[#allocation2 + $0x70] sm:$0xff]  ;;  %v242_v56 = vld [vmem:[#allocation2 + $0x128] sm:$0xff]  ;;  %v244_v57 = vld [vmem:[#allocation2 + $0x138] sm:$0xff] }
  0x21   :  { %v753_v54 = vpack.c.bf16 %v46_v53, %v44_v52  ;;  %v241_v58 = vld [vmem:[#allocation2 + $0x120] sm:$0xff]  ;;  %v243_v59 = vld [vmem:[#allocation2 + $0x130] sm:$0xff]  ;;  %v755_v61 = vpack.c.bf16 %v244_v57, %v242_v56  ;;  %v246_v62 = vld [vmem:[#allocation2 + $0x148] sm:$0xff] }
  0x22   :  { %v48_v60 = vld [vmem:[#allocation2 + $0x80] sm:$0xff]  ;;  %v248_v63 = vld [vmem:[#allocation2 + $0x158] sm:$0xff]  ;;  %v30_v1 = vld [vmem:[%s1006_s0] sm:$0xff]  ;;  %v757_v2 = vpack.c.bf16 %v243_v59, %v241_v58 }
  0x23   :  { %738 = vmatpush1.bf16.msra.mxu0 %v737_v24  ;;  %786 = vmatpush1.bf16.msra.mxu1 %v737_v24  ;;  %v711_v3 = vld [vmem:[%s1006_s0 + $0x18] sm:$0xff]  ;;  %v759_v4 = vpack.c.bf16 %v248_v63, %v246_v62  ;;  %v245_v5 = vld [vmem:[#allocation2 + $0x140] sm:$0xff]  ;;  %v247_v6 = vld [vmem:[#allocation2 + $0x150] sm:$0xff] }
  0x24   :  { %94 = vmatprep.subr.mxu0 %v70_v25  ;;  %428 = vmatprep.subr.mxu1 %v70_v25  ;;  %v250_v7 = vld [vmem:[#allocation2 + $0x168] sm:$0xff]  ;;  %v252_v8 = vld [vmem:[#allocation2 + $0x178] sm:$0xff]  ;;  %v761_v9 = vpack.c.bf16 %v247_v6, %v245_v5  ;;  %v712_v11 = vld [vmem:[%s1006_s0 + $0x20] sm:$0xff] }
  0x25   :  { %v31_v10 = vld [vmem:[%s1006_s0 + $0x8] sm:$0xff]  ;;  %v763_v12 = vpack.c.bf16 %v252_v8, %v250_v7  ;;  %v249_v13 = vld [vmem:[#allocation2 + $0x160] sm:$0xff]  ;;  %v251_v14 = vld [vmem:[#allocation2 + $0x170] sm:$0xff] }
  0x26   :  { %v254_v15 = vld [vmem:[#allocation2 + $0x188] sm:$0xff]  ;;  %v256_v16 = vld [vmem:[#allocation2 + $0x198] sm:$0xff]  ;;  %v765_v17 = vpack.c.bf16 %v251_v14, %v249_v13  ;;  %v253_v19 = vld [vmem:[#allocation2 + $0x180] sm:$0xff] }
  0x27   :  { %95 = vmatpush1.msra.mxu0 %v69_v30  ;;  %429 = vmatpush1.msra.mxu1 %v69_v30  ;;  %v767_v18 = vpack.c.bf16 %v256_v16, %v254_v15  ;;  %v255_v20 = vld [vmem:[#allocation2 + $0x190] sm:$0xff]  ;;  %v258_v22 = vld [vmem:[#allocation2 + $0x1a8] sm:$0xff]  ;;  %v257_v23 = vld [vmem:[#allocation2 + $0x1a0] sm:$0xff]  ;;  %v349_v30 = vsub.s32 0, %v348_v29 }
  0x28   :  { %740 = vmatprep.subr.bf16.mxu0 %v739_v31  ;;  %788 = vmatprep.subr.bf16.mxu1 %v739_v31  ;;  %v769_v21 = vpack.c.bf16 %v255_v20, %v253_v19  ;;  %v238_v24 = vld [vmem:[%s1006_s0 + $0x2] sm:$0xff]  ;;  %v719_v25 = vld [vmem:[%s1006_s0 + $0x1a] sm:$0xff]  ;;  %v239_v26 = vld [vmem:[%s1006_s0 + $0xa] sm:$0xff] }
  0x29   :  { %705 = vmatmul.mubr.msk.f32.vlgmr.msra.gmra.mrb[0].mxu0 %vm71_vm0, %v50_v34  ;;  %715 = vmatmul.mubr.msk.f32.vlgmr.msra.gmra.mrb[0].mxu1 %vm71_vm0, %v713_v36  ;;  %v720_v27 = vld [vmem:[%s1006_s0 + $0x22] sm:$0xff]  ;;  %v29_v31 = vld [vmem:[%s1008_s2] sm:$0x3]  ;;  %s892_s0 = smov [#allocation5]  }
  0x2a   :  { %742 = vmatpush1.bf16.msra.mxu0 %v741_v35  ;;  %790 = vmatpush1.bf16.msra.mxu1 %v741_v35  ;;  %v350_v32 = vrot.slane %v29_v31, %v349_v30  ;;  %s693_s1 = sshll.u32 %s892_s0, 4  ;;  %s694_s1 = int_to_ptr.vmem [resolvable:$true] %s693_s1 }
  0x2b   :  { %744 = vmatprep.subr.bf16.mxu0 %v743_v37  ;;  %792 = vmatprep.subr.bf16.mxu1 %v743_v37  ;;  %s862_s2 = scalar_lea.vmem %s694_s1, 1024  ;;  %p867_p9 = scmp.lt.s32.totalorder %s694_s1, %s694_s1 }
  0x2c   :  { %148 = vmatprep.mubr.f32.mxu0 %v891_v0  ;;  %482 = vmatprep.mubr.f32.mxu1 %v891_v0  ;;  %p863_p8 = scmp.ne.s32.totalorder %s694_s1, %s862_s2  ;;  %p868_p10 = scmp.lt.s32.totalorder %s862_s2, %s862_s2 }
  0x2d   :  { %706 = vmatmul.mubr.msk.f32.gmra.mrb[2].mxu0 %vm71_vm0, %v51_v43  ;;  %716 = vmatmul.mubr.msk.f32.gmra.mrb[2].mxu1 %vm71_vm0, %v714_v44 }
  0x2e   :  { %746 = vmatpush1.bf16.msra.mxu0 %v745_v42  ;;  %794 = vmatpush1.bf16.msra.mxu1 %v745_v42  ;;  %p869_p11 = por %p868_p10, %p867_p9 }
  0x2f   :  { %748 = vmatprep.subr.bf16.mxu0 %v747_v45  ;;  %796 = vmatprep.subr.bf16.mxu1 %v747_v45 }
  0x30   :  { %225 = vmatprep.mubr.f32.mxu0 %v891_v0  ;;  %559 = vmatprep.mubr.f32.mxu1 %v891_v0  ;;  %p870_p12 = pnand %p869_p11, %p863_p8 }
  0x32   :  { %750 = vmatpush1.bf16.msra.mxu0 %v749_v50  ;;  %798 = vmatpush1.bf16.msra.mxu1 %v749_v50 }
  0x33   :  { %752 = vmatprep.subr.bf16.mxu0 %v751_v51  ;;  %800 = vmatprep.subr.bf16.mxu1 %v751_v51 }
  0x36   :  { %754 = vmatpush1.bf16.msra.mxu0 %v753_v54  ;;  %802 = vmatpush1.bf16.msra.mxu1 %v753_v54 }
  0x37   :  { %177 = vmatprep.subr.mxu0 %v49_v55  ;;  %511 = vmatprep.subr.mxu1 %v49_v55 }
  0x3a   :  { %178 = vmatpush1.msra.mxu0 %v48_v60  ;;  %512 = vmatpush1.msra.mxu1 %v48_v60 }
  0x3b   :  { %756 = vmatprep.subr.bf16.mxu0 %v755_v61  ;;  %804 = vmatprep.subr.bf16.mxu1 %v755_v61 }
  0x3c   :  { %707 = vmatmul.mubr.msk.f32.vlgmr.msra.gmra.mrb[0].mxu0 %vm71_vm0, %v30_v1  ;;  %717 = vmatmul.mubr.msk.f32.vlgmr.msra.gmra.mrb[0].mxu1 %vm71_vm0, %v711_v3 }
  0x3d   :  { %758 = vmatpush1.bf16.msra.mxu0 %v757_v2  ;;  %806 = vmatpush1.bf16.msra.mxu1 %v757_v2 }
  0x3e   :  { %760 = vmatprep.subr.bf16.mxu0 %v759_v4  ;;  %808 = vmatprep.subr.bf16.mxu1 %v759_v4 }
  0x3f   :  { %231 = vmatprep.mubr.f32.mxu0 %v891_v0  ;;  %565 = vmatprep.mubr.f32.mxu1 %v891_v0 }
  0x40   :  { %708 = vmatmul.mubr.msk.f32.gmra.mrb[2].mxu0 %vm71_vm0, %v31_v10  ;;  %718 = vmatmul.mubr.msk.f32.gmra.mrb[2].mxu1 %vm71_vm0, %v712_v11 }
  0x41   :  { %762 = vmatpush1.bf16.msra.mxu0 %v761_v9  ;;  %810 = vmatpush1.bf16.msra.mxu1 %v761_v9 }
  0x42   :  { %764 = vmatprep.subr.bf16.mxu0 %v763_v12  ;;  %812 = vmatprep.subr.bf16.mxu1 %v763_v12 }
  0x43   :  { %329 = vmatprep.mubr.f32.mxu0 %v891_v0  ;;  %662 = vmatprep.mubr.f32.mxu1 %v891_v0 }
  0x45   :  { %766 = vmatpush1.bf16.msra.mxu0 %v765_v17  ;;  %814 = vmatpush1.bf16.msra.mxu1 %v765_v17 }
  0x46   :  { %768 = vmatprep.subr.bf16.mxu0 %v767_v18  ;;  %816 = vmatprep.subr.bf16.mxu1 %v767_v18 }
  0x49   :  { %770 = vmatpush1.bf16.msra.mxu0 %v769_v21  ;;  %818 = vmatpush1.bf16.msra.mxu1 %v769_v21 }
  0x4a   :  { %281 = vmatprep.subr.mxu0 %v258_v22  ;;  %614 = vmatprep.subr.mxu1 %v258_v22 }
  0x4d   :  { %282 = vmatpush1.msra.mxu0 %v257_v23  ;;  %615 = vmatpush1.msra.mxu1 %v257_v23 }
  0x4e   :  { %709 = vmatmul.mubr.msk.f32.vlgmr.msra.gmra.mrb[0].mxu0 %vm71_vm0, %v238_v24  ;;  %721 = vmatmul.mubr.msk.f32.vlgmr.msra.gmra.mrb[0].mxu1 %vm71_vm0, %v719_v25 }
  0x4f   :  { %335 = vmatprep.mubr.f32.mxu0 %v891_v0  ;;  %668 = vmatprep.mubr.f32.mxu1 %v891_v0  ;;  %v353_v0 = vsub.s32 1, %v348_v29 }
  0x51   :  { %v354_v33 = vrot.slane %v29_v31, %v353_v0 }
  0x52   :  { %710 = vmatmul.mubr.msk.f32.gmra.mrb[2].mxu0 %vm71_vm0, %v239_v26  ;;  %722 = vmatmul.mubr.msk.f32.gmra.mrb[2].mxu1 %vm71_vm0, %v720_v27 }
 0x121   :  { %v331_v34 = vpop.f32.mrb[0].mxu0  ;;  %v664_v35 = vpop.f32.mrb[0].mxu1 }
 0x122   :  { %v357_v36 = vadd.f32 %v350_v32, %v331_v34  ;;  %v679_v37 = vadd.f32 %v664_v35, %v350_v32  ;;  %v333_v38 = vpop.f32.mrb[1].mxu0  ;;  %v666_v39 = vpop.f32.mrb[1].mxu1 }
 0x123   :  { %v358_v40 = vadd.f32 %v354_v33, %v333_v38  ;;  %v680_v41 = vadd.f32 %v666_v39, %v354_v33 }
 0x124   :  { %361 = vst [vmem:[#allocation5] sm:$0xff] %v357_v36  ;;  %684 = vst [vmem:[#allocation5 + $0x20] sm:$0xff] %v679_v37 }
 0x125   :  { %362 = vst [vmem:[#allocation5 + $0x8] sm:$0xff] %v358_v40  ;;  %685 = vst [vmem:[#allocation5 + $0x28] sm:$0xff] %v680_v41  ;;  %v337_v42 = vpop.f32.mrb[2].mxu0  ;;  %v670_v43 = vpop.f32.mrb[2].mxu1 }
 0x126   :  { %v359_v44 = vadd.f32 %v350_v32, %v337_v42  ;;  %v681_v45 = vadd.f32 %v670_v43, %v350_v32  ;;  %v339_v46 = vpop.f32.mrb[3].mxu0  ;;  %v672_v47 = vpop.f32.mrb[3].mxu1 }
 0x127   :  { %v360_v48 = vadd.f32 %v354_v33, %v339_v46  ;;  %v682_v49 = vadd.f32 %v672_v47, %v354_v33 }
 0x128   :  { %363 = vst [vmem:[#allocation5 + $0x10] sm:$0xff] %v359_v44  ;;  %686 = vst [vmem:[#allocation5 + $0x30] sm:$0xff] %v681_v45 }
 0x129   :  { %364 = vst [vmem:[#allocation5 + $0x18] sm:$0xff] %v360_v48  ;;  %687 = vst [vmem:[#allocation5 + $0x38] sm:$0xff] %v682_v49 }
 0x12a   :  { %873 = shalt.err (!%p870_p12)
}
 0x12b   :  { %s874_s28 = scalar_lea.hbm %s1009_s3, 1024 }
 0x12c   :  { %p875_p13 = scmp.ne.s32.totalorder %s1009_s3, %s874_s28  ;;  %p878_p0 = scmp.lt.u32.totalorder %s874_s28, %s1009_s3 }
 0x12e   :  { %p880_p1 = pnand %p878_p0, %p875_p13 }
 0x130   :  { %883 = shalt.err (!%p880_p1)
}
 0x131   :  { %699 = dma.vmem_to_hbm [thread:$0]  %s694_s1, 1024, %s1009_s3, [#allocation4], %s889_s22, %s889_s22, %s890_s23  }
 0x132   :  { %886 = dma.done.wait [#allocation4], 1024  }
 0x133   :  { %887 = vsyncadd [#allocation4], 4294966272 }
 0x134   :  { %703 = vsyncpa [#allocation3], 1 }
 0x135   :  { %704 = vsyncpa [#allocation4], 1 }

</bundles_post_ra>
